<compile_context>
chip_gen: v7x
topology: tpu7x:2x2x1
jax: 0.10.0
libtpu: 0.0.40
codegen_flags: <defaults>
</compile_context>

<pallas_src>
import jax
import jax.numpy as jnp
from jax.experimental import pallas as pl
from jax.experimental.pallas import tpu as pltpu


# Per-block VMEM budget (bytes). With input + output each double-buffered,
# total VMEM use is ~4x this, which stays comfortably inside the scoped-VMEM
# default on v5e (16 MiB), v6e (32 MiB) and v7x (32 MiB scoped / 64 MiB phys).
_MAX_BLOCK_BYTES = 2 * 1024 * 1024
# Measured tiled-copy data: 512-2048 row tiles reach ~85% of HBM bandwidth.
_MAX_TILE_ROWS = 2048


def _crop_kernel(x_ref, o_ref):
    # x_ref: (TILE_R, crop_size) window already selected by the BlockSpec
    # (index_map points at column-block 0, i.e. the first crop_size lanes).
    # The "compute" is a pure copy of the cropped window.
    o_ref[...] = x_ref[...]


def horizontal_crop(vector: jax.Array, crop_size: int):
    """Pallas implementation of HorizontalCrop.forward.

    Args:
      vector: (B, H, W) array. Each `vector[b]` is one track.
      crop_size: number of leading columns to keep. Must be a multiple of 128
                 or equal to W (lane-dense output constraint on TPU).

    Returns:
      list of length B with arrays of shape (H, crop_size), same dtype.
    """
    B, H, W = vector.shape
    if crop_size > W:
        raise ValueError(f"crop_size={crop_size} exceeds width W={W}")
    if crop_size != W and crop_size % 128 != 0:
        raise ValueError(
            f"crop_size={crop_size} must be a multiple of 128 (or equal to "
            f"W={W}) to keep TPU output stores lane-dense.")

    # Flatten the batch and row axes into one big sublane axis.
    rows = B * H
    x2d = vector.reshape(rows, W)

    itemsize = jnp.dtype(vector.dtype).itemsize

    # Pick the largest row tile that (a) fits the per-block VMEM budget,
    # (b) respects the (8, 128) tiling rule (multiple of 8, or the full
    # extent), and (c) doesn't exceed the ~2048-row sweet spot.
    max_rows_by_vmem = max(8, (_MAX_BLOCK_BYTES // (crop_size * itemsize)) // 8 * 8)
    if rows <= max_rows_by_vmem:
        tile_r = rows                      # single / full-extent row block
    else:
        tile_r = min(max_rows_by_vmem, _MAX_TILE_ROWS)
        tile_r = max(8, (tile_r // 8) * 8)  # keep sublane divisibility

    grid = (pl.cdiv(rows, tile_r),)

    bytes_accessed = 2 * rows * crop_size * itemsize  # read + write of the crop
    cost = pl.CostEstimate(flops=0, transcendentals=0,
                           bytes_accessed=bytes_accessed)

    cropped2d = pl.pallas_call(
        _crop_kernel,
        out_shape=jax.ShapeDtypeStruct((rows, crop_size), vector.dtype),
        grid_spec=pltpu.PrefetchScalarGridSpec(
            num_scalar_prefetch=0,
            grid=grid,
            in_specs=[
                # Only DMA the first `crop_size` columns of each row tile.
                pl.BlockSpec((tile_r, crop_size), lambda r: (r, 0)),
            ],
            out_specs=pl.BlockSpec((tile_r, crop_size), lambda r: (r, 0)),
        ),
        compiler_params=pltpu.CompilerParams(
            dimension_semantics=("parallel",),
        ),
        cost_estimate=cost,
    )(x2d)

    # Match the PyTorch module's return type (a Python list of per-track
    # crops) with a single split instead of B individual slice dispatches.
    # rows == B*H, so each part is exactly (H, crop_size).
    return jnp.split(cropped2d, B, axis=0)


if __name__ == "__main__":
    # Small, TPU-tiling-friendly shapes: 2 tracks, each (8, 256); crop to 128.
    B, H, W = 2, 8, 256
    crop_size = 128

    key = jax.random.PRNGKey(0)
    x = jax.random.normal(key, (B, H, W), dtype=jnp.float32)

    out_list = horizontal_crop(x, crop_size)
    out_list = [jax.block_until_ready(o) for o in out_list]

    # Reference check against plain slicing (same semantics as the PyTorch loop).
    for b in range(B):
        ref = x[b, :, :crop_size]
        assert out_list[b].shape == (H, crop_size)
        assert out_list[b].dtype == x.dtype
        assert jnp.array_equal(out_list[b], ref)

    print("KERNEL_OK")
</pallas_src>

<mosaic_0001>
module attributes {stable_mosaic.version = 11 : i64} {
  func.func @_crop_kernel(%arg0: i32, %arg1: memref<16x128xf32, #tpu.memory_space<vmem>>, %arg2: memref<16x128xf32, #tpu.memory_space<vmem>>) attributes {dimension_semantics = [#tpu.dimension_semantics<parallel>], iteration_bounds = array<i64: 1>, scalar_prefetch = 0 : i64, scratch_operands = 0 : i64, tpu.core_type = #tpu.core_type<tc>, window_params = [{transform_indices = @transform_0, window_bounds = array<i64: 16, 128>}, {transform_indices = @transform_1, window_bounds = array<i64: 16, 128>}]} {
    %c0 = arith.constant 0 : index
    %c0_0 = arith.constant 0 : index
    %0 = vector.load %arg1[%c0, %c0_0] : memref<16x128xf32, #tpu.memory_space<vmem>>, vector<16x128xf32>
    %c0_1 = arith.constant 0 : index
    %c0_2 = arith.constant 0 : index
    %1 = vector.load %arg2[%c0_1, %c0_2] : memref<16x128xf32, #tpu.memory_space<vmem>>, vector<16x128xf32>
    tpu.vector_store %arg2[%c0_1, %c0_2], %0 {strides = array<i32>} : memref<16x128xf32, #tpu.memory_space<vmem>>, vector<16x128xf32>,
    return
  }
  func.func @transform_0(%arg0: i32) -> (i32, i32) {
    %c0_i32 = arith.constant 0 : i32
    %c0_i32_0 = arith.constant 0 : i32
    return %arg0, %c0_i32 : i32, i32
  }
  func.func @transform_1(%arg0: i32) -> (i32, i32) {
    %c0_i32 = arith.constant 0 : i32
    %c0_i32_0 = arith.constant 0 : i32
    return %arg0, %c0_i32 : i32, i32
  }
}

</mosaic_0001>

<bundles_post_ra>
// kernel: tpu_custom_call.1
= control target key start
LH: loop header
LB: loop body
LE: loop exit
PB: predicated region body
PF: predicated region fallthrough
CT: control target
= control target key end

     0   :  { %6 = vsyncpa [#allocation3], 0  ;;  %s139_s0 = inlined_call_operand.hbm [shape: f32[16,256], index: 0, kind: input, shape index: {}]   ;;  %s140_s1 = inlined_call_operand.hbm [shape: f32[16,128], index: 1, kind: output, shape index: {}]  }
   0x1   :  { %7 = vsyncpa [#allocation4], 0  ;;  %s97_s6 = smov [#allocation2]   ;;  %s49_s10 = scalar_lea.hbm %s139_s0, 256 }
   0x2   :  { %s13_s7 = sshll.u32 %s97_s6, 4  ;;  %p50_p0 = scmp.ne.s32.totalorder %s139_s0, %s49_s10  ;;  %s14_s7 = int_to_ptr.vmem [resolvable:$true] %s13_s7 }
   0x3   :  { %s51_s15 = scalar_lea.hbm %s139_s0, 512  ;;  %p53_p2 = scmp.lt.u32.totalorder %s49_s10, %s139_s0 }
   0x4   :  { %p52_p1 = scmp.lt.u32.totalorder %s51_s15, %s49_s10 }
   0x6   :  { %p54_p3 = por %p53_p2, %p52_p1 }
   0x8   :  { %p55_p4 = pnand %p54_p3, %p50_p0 }
   0xa   :  { %58 = shalt.err (!%p55_p4)
}
   0xb   :  { %s59_s18 = scalar_lea.vmem %s14_s7, 256  ;;  %p64_p6 = scmp.lt.s32.totalorder %s14_s7, %s14_s7 }
   0xc   :  { %p60_p5 = scmp.ne.s32.totalorder %s14_s7, %s59_s18  ;;  %p65_p7 = scmp.lt.s32.totalorder %s59_s18, %s59_s18 }
   0xe   :  { %p66_p8 = por %p65_p7, %p64_p6 }
  0x10   :  { %p67_p9 = pnand %p66_p8, %p60_p5 }
  0x12   :  { %70 = shalt.err (!%p67_p9)
}
  0x13   :  { %s98_s19 = smov 256   ;;  %s99_s20 = smov 128  }
  0x14   :  { %s100_s21 = smov 8  }
  0x15   :  { %19 = dma.hbm_to_vmem [thread:$0]  %s139_s0, 256, %s14_s7, [#allocation3], %s98_s19, %s99_s20, %s100_s21  }
  0x16   :  { %93 = dma.done.wait [#allocation3], 256  }
  0x17   :  { %94 = vsyncadd [#allocation3], 4294967040  ;;  %s101_s24 = smov [#allocation5]   ;;  %v23_v0 = vld [vmem:[#allocation2] sm:$0xff]  ;;  %v24_v1 = vld [vmem:[#allocation2 + $0x8] sm:$0xff] }
  0x18   :  { %s32_s25 = sshll.u32 %s101_s24, 4  ;;  %25 = vst [vmem:[#allocation5] sm:$0xff] %v23_v0  ;;  %26 = vst [vmem:[#allocation5 + $0x8] sm:$0xff] %v24_v1  ;;  %s33_s25 = int_to_ptr.vmem [resolvable:$true] %s32_s25 }
  0x19   :  { %s71_s26 = scalar_lea.vmem %s33_s25, 256  ;;  %p76_p11 = scmp.lt.s32.totalorder %s33_s25, %s33_s25 }
  0x1a   :  { %p72_p10 = scmp.ne.s32.totalorder %s33_s25, %s71_s26  ;;  %p77_p12 = scmp.lt.s32.totalorder %s71_s26, %s71_s26 }
  0x1c   :  { %p78_p13 = por %p77_p12, %p76_p11 }
  0x1e   :  { %p79_p0 = pnand %p78_p13, %p72_p10 }
  0x20   :  { %82 = shalt.err (!%p79_p0)
}
  0x21   :  { %s83_s0 = scalar_lea.hbm %s140_s1, 256 }
  0x22   :  { %p84_p1 = scmp.ne.s32.totalorder %s140_s1, %s83_s0  ;;  %p87_p2 = scmp.lt.u32.totalorder %s83_s0, %s140_s1 }
  0x24   :  { %p89_p3 = pnand %p87_p2, %p84_p1 }
  0x26   :  { %92 = shalt.err (!%p89_p3)
}
  0x27   :  { %38 = dma.vmem_to_hbm [thread:$0]  %s33_s25, 256, %s140_s1, [#allocation4], %s99_s20, %s99_s20, %s100_s21  }
  0x28   :  { %95 = dma.done.wait [#allocation4], 256  }
  0x29   :  { %96 = vsyncadd [#allocation4], 4294967040 }
  0x2a   :  { %42 = vsyncpa [#allocation3], 1 }
  0x2b   :  { %43 = vsyncpa [#allocation4], 1 }

</bundles_post_ra>
